<compile_context>
chip_gen: v5e
topology: v5e:2x2
jax: 0.10.0
libtpu: 0.0.40
codegen_flags: <defaults>
</compile_context>

<pallas_src>
import numpy as np

import jax
import jax.numpy as jnp
from jax.experimental import pallas as pl
from jax.experimental.pallas import tpu as pltpu


def _round_up(v, m):
    return ((v + m - 1) // m) * m


def _dft_matrices(N, M, Np, Mcols):
    """Forward (Np, Mcols), Re/Im-swap (Mcols, Mcols) and inverse (Mcols, Np) real-DFT
    matrices for the packed [Re | Im] mode layout.  Built in float64, stored float32."""
    n = np.arange(N, dtype=np.float64)
    k = np.arange(M, dtype=np.float64)
    ang = 2.0 * np.pi * np.outer(n, k) / N                    # (N, M)

    f = np.zeros((Np, Mcols), dtype=np.float64)
    f[:N, :M] = np.cos(ang)                                   # Re part of rfft
    f[:N, M:2 * M] = -np.sin(ang)                             # Im part of rfft

    # irfft of a spectrum that is zero beyond the first M bins: DC (and Nyquist, if
    # present) weighted once, every other bin twice; overall /N.
    kk = np.arange(M)
    wgt = np.where((kk == 0) | ((N % 2 == 0) & (kk == N // 2)), 1.0, 2.0)
    ang2 = 2.0 * np.pi * np.outer(kk.astype(np.float64), n) / N   # (M, N)
    g = np.zeros((Mcols, Np), dtype=np.float64)
    g[:M, :N] = wgt[:, None] * np.cos(ang2) / N               # multiplies Re(out_ft)
    g[M:2 * M, :N] = -wgt[:, None] * np.sin(ang2) / N         # multiplies Im(out_ft)

    # Permutation swapping the Re and Im halves:  xs = xp @ p  ->  [Im | Re | 0...].
    p = np.zeros((Mcols, Mcols), dtype=np.float32)
    p[np.arange(M) + M, np.arange(M)] = 1.0                   # col k     <- row M+k (Im)
    p[np.arange(M), np.arange(M) + M] = 1.0                   # col M+k   <- row k   (Re)

    return (jnp.asarray(f.astype(np.float32)),
            jnp.asarray(g.astype(np.float32)),
            jnp.asarray(p))


def _vmem_capacity_bytes():
    """Physical VMEM per TensorCore; conservative 64 MiB (v7x) if the query fails."""
    try:
        cap = int(getattr(pltpu.get_tpu_info(), "vmem_capacity_bytes", 0) or 0)
        if cap > 0:
            return cap
    except Exception:
        pass
    return 64 * 1024 * 1024


def _vmem_footprint(bt, C, O, Np, Mcols, in_bytes, out_bytes):
    """Conservative per-step VMEM estimate: double-buffered x/out blocks, the
    grid-invariant matrices/weights (counted double-buffered), and kernel temps."""
    blocks = 2 * bt * C * Np * in_bytes + 2 * bt * O * Np * out_bytes
    invariants = 2 * (2 * Np * Mcols * in_bytes         # Fp, Gp
                      + Mcols * Mcols * 4               # P
                      + 2 * C * O * Mcols * 4)          # packed weights
    temps = (2 * bt * C * Mcols + 2 * bt * O * Mcols + bt * O * Np) * 4
    return blocks + invariants + temps


def _pick_block_b(B, C, fits):
    """Largest divisor of B that (a) fits the VMEM budget, (b) roughly fills the
    256-row MXU (bt*C ~ 256), and (c) leaves >= 2 grid steps (v7x has 2 TensorCores)."""
    divisors = [d for d in range(1, B + 1) if B % d == 0]
    ok = [d for d in divisors if fits(d)] or [1]
    cap = max(1, -(-256 // max(C, 1)))                  # ceil(256 / C)
    capped = [d for d in ok if d <= cap] or [min(ok)]
    two_step = [d for d in capped if B // d >= 2]
    return max(two_step) if two_step else max(capped)


def _spectral_conv1d_kernel(x_ref, f_ref, p_ref, wa_ref, wb_ref, g_ref, o_ref):
    bt, c_in, npad = x_ref.shape
    o_ch = wa_ref.shape[1]
    mcols = f_ref.shape[1]

    # ---- forward truncated real DFT: packed [Re | Im] spectrum (MXU) -------------
    x2 = x_ref[...].reshape(bt * c_in, npad)
    xp = jnp.dot(x2, f_ref[...], preferred_element_type=jnp.float32)   # (bt*C, Mcols)
    # Swapped halves [Im | Re] via a tiny permutation matmul (K = Mcols << Np).
    xs = jnp.dot(xp, p_ref[...], preferred_element_type=jnp.float32)   # (bt*C, Mcols)
    xp = xp.reshape(bt, c_in, mcols)
    xs = xs.reshape(bt, c_in, mcols)

    # ---- complex channel mixing: accumulating loop over input channels (VPU) -----
    # wa = [wr | wr], wb = [-wi | wi]  =>
    #   lanes [0, M)  : sum_c Re*wr - Im*wi   (Re of mixed spectrum)
    #   lanes [M, 2M) : sum_c Im*wr + Re*wi   (Im of mixed spectrum)
    # Peak temporaries are (bt, O, Mcols); the old 4-D broadcast needed C x that and
    # spilled through the vst/vld slots.
    # TODO(synk): when bt, C, O are all >= 128 this contraction is worth moving onto
    # the MXU via a mode-leading dot_general; at typical FNO sizes the loop is cheaper.
    acc = jnp.zeros((bt, o_ch, mcols), dtype=jnp.float32)
    for c in range(c_in):                               # static trip count, unrolled
        acc = (acc
               + xp[:, c:c + 1, :] * wa_ref[c][None]
               + xs[:, c:c + 1, :] * wb_ref[c][None])

    # ---- inverse truncated real DFT back to the spatial grid (MXU) ---------------
    y = jnp.dot(acc.reshape(bt * o_ch, mcols).astype(g_ref.dtype), g_ref[...],
                preferred_element_type=jnp.float32)                    # (bt*O, Np)
    o_ref[...] = y.reshape(bt, o_ch, npad).astype(o_ref.dtype)


def spectral_conv1d(x, w_real, w_imag, *, block_b=None, compute_dtype=jnp.float32):
    """x: (B, C_in, N); w_*: (C_in, C_out, modes1) with C_out == modes1 (required by the
    reference einsum 'bci,cio->boi').  Returns (B, C_out, N) in x.dtype.

    compute_dtype=jnp.bfloat16 casts x and the DFT matrices for full-rate MXU on
    v6e/v7x (accumulation stays f32); validate tolerance vs spectral_conv1d_ref first.
    """
    B, C, N = x.shape
    Cw, O, M = w_real.shape
    assert Cw == C, "in_channels mismatch between x and weights"
    assert O == M, (
        "SpectralConv1d's einsum 'bci,cio->boi' only type-checks when "
        "out_channels == modes1; the effective weight is W[c,o,m] = weights[c,m,o].")
    assert M <= N // 2 + 1, "modes1 must be <= N//2 + 1"

    # Effective standard-layout weights: W[c, o, m] = weights[c, m, o].
    wr = jnp.swapaxes(w_real, 1, 2).astype(jnp.float32)    # (C, O, M)
    wi = jnp.swapaxes(w_imag, 1, 2).astype(jnp.float32)

    # Packed-lane sizes (everything lane-dense; padded entries are exactly zero).
    Mcols = _round_up(2 * M, 128)
    Np = _round_up(N, 128)

    # Packed mixing weights for the [Re | Im] layout.
    pad3 = ((0, 0), (0, 0), (0, Mcols - 2 * M))
    wa = jnp.pad(jnp.concatenate([wr, wr], axis=-1), pad3)       # (C, O, Mcols)
    wb = jnp.pad(jnp.concatenate([-wi, wi], axis=-1), pad3)      # (C, O, Mcols)

    f_mat, g_mat, p_mat = _dft_matrices(N, M, Np, Mcols)
    f_mat = f_mat.astype(compute_dtype)
    g_mat = g_mat.astype(compute_dtype)

    x_p = x if Np == N else jnp.pad(x, ((0, 0), (0, 0), (0, Np - N)))
    x_p = x_p.astype(compute_dtype)

    # --- per-generation sizing: VMEM budget, MXU row fill, >= 2 grid steps --------
    capacity = _vmem_capacity_bytes()
    budget = max(32 * 1024 * 1024, min(int(0.70 * capacity), 96 * 1024 * 1024))
    in_bytes = np.dtype(compute_dtype).itemsize
    out_bytes = np.dtype(x.dtype).itemsize
    fits = lambda d: _vmem_footprint(d, C, O, Np, Mcols, in_bytes, out_bytes) <= budget
    bt = _pick_block_b(B, C, fits) if block_b is None else block_b
    assert B % bt == 0
    grid = (B // bt,)

    flops = (2 * B * C * Np * Mcols           # forward DFT
             + 2 * B * C * Mcols * Mcols      # Re/Im swap permutation
             + 4 * B * C * O * Mcols          # packed complex channel mixing
             + 2 * B * O * Mcols * Np)        # inverse DFT
    bytes_accessed = (x_p.size * x_p.dtype.itemsize
                      + B * O * Np * out_bytes
                      + (f_mat.size + g_mat.size) * in_bytes
                      + p_mat.size * 4 + (wa.size + wb.size) * 4)
    cost = pl.CostEstimate(flops=int(flops), transcendentals=0,
                           bytes_accessed=int(bytes_accessed))

    def make_call(single_buffer_invariants):
        # Grid-invariant operands never change across the grid; one VMEM buffer each.
        inv = {"pipeline_mode": pl.Buffered(1)} if single_buffer_invariants else {}
        in_specs = [
            pl.BlockSpec((bt, C, Np), lambda i: (i, 0, 0)),            # x, bt batches/step
            pl.BlockSpec((Np, Mcols), lambda i: (0, 0), **inv),        # forward DFT
            pl.BlockSpec((Mcols, Mcols), lambda i: (0, 0), **inv),     # Re/Im swap perm
            pl.BlockSpec((C, O, Mcols), lambda i: (0, 0, 0), **inv),   # packed W (same)
            pl.BlockSpec((C, O, Mcols), lambda i: (0, 0, 0), **inv),   # packed W (cross)
            pl.BlockSpec((Mcols, Np), lambda i: (0, 0), **inv),        # inverse DFT
        ]
        return pl.pallas_call(
            _spectral_conv1d_kernel,
            out_shape=jax.ShapeDtypeStruct((B, O, Np), x.dtype),
            grid=grid,
            in_specs=in_specs,
            out_specs=pl.BlockSpec((bt, O, Np), lambda i: (i, 0, 0)),
            compiler_params=pltpu.CompilerParams(
                dimension_semantics=("parallel",),
                vmem_limit_bytes=int(budget)),
            cost_estimate=cost,
        )

    args = (x_p, f_mat, p_mat, wa, wb, g_mat)
    try:
        y = make_call(True)(*args)
        y.block_until_ready()
    except Exception:
        # Single-buffered pipeline_mode unavailable in this build: default buffering.
        y = make_call(False)(*args)

    # TODO(synk): if N % 128 != 0 in production, fuse this trailing slice into the
    # consumer (it is a separate XLA HBM copy of roughly the whole output).
    return y[..., :N] if Np != N else y


def spectral_conv1d_ref(x, w_real, w_imag):
    """Pure-JAX mirror of the PyTorch forward (same einsum labelling)."""
    B, C, N = x.shape
    _, O, M = w_real.shape
    x_ft = jnp.fft.rfft(x, axis=-1)
    w = (w_real + 1j * w_imag).astype(jnp.complex64)
    mixed = jnp.einsum('bci,cio->boi', x_ft[:, :, :M], w)   # requires O == M, as in the module
    out_ft = jnp.zeros((B, O, x_ft.shape[-1]), dtype=jnp.complex64)
    out_ft = out_ft.at[:, :, :M].set(mixed)
    return jnp.fft.irfft(out_ft, n=N, axis=-1).astype(x.dtype)


if __name__ == "__main__":
    # Small shapes consistent with SpectralConv1d; the module's einsum needs
    # out_channels == modes1, and modes1 <= N//2 + 1.
    in_channels, out_channels, modes1 = 4, 8, 8
    batch, N = 2, 16

    key = jax.random.PRNGKey(0)
    kx, kwr, kwi = jax.random.split(key, 3)

    x = jax.random.normal(kx, (batch, in_channels, N), dtype=jnp.float32)

    scale = 1.0 / (in_channels * out_channels)
    w_real = scale * jax.random.normal(
        kwr, (in_channels, out_channels, modes1), dtype=jnp.float32)
    w_imag = scale * jax.random.normal(
        kwi, (in_channels, out_channels, modes1), dtype=jnp.float32)

    y = jax.block_until_ready(spectral_conv1d(x, w_real, w_imag))
    y_ref = jax.block_until_ready(spectral_conv1d_ref(x, w_real, w_imag))

    assert y.shape == (batch, out_channels, N)
    err = float(jnp.max(jnp.abs(y - y_ref)))
    assert jnp.allclose(y, y_ref, atol=1e-4, rtol=1e-4), err
    print("KERNEL_OK")
</pallas_src>

<mosaic_0001>
module attributes {stable_mosaic.version = 11 : i64} {
  func.func @_spectral_conv1d_kernel(%arg0: i32, %arg1: memref<1x4x128xf32, #tpu.memory_space<vmem>>, %arg2: memref<128x128xf32, #tpu.memory_space<vmem>>, %arg3: memref<128x128xf32, #tpu.memory_space<vmem>>, %arg4: memref<4x8x128xf32, #tpu.memory_space<vmem>>, %arg5: memref<4x8x128xf32, #tpu.memory_space<vmem>>, %arg6: memref<128x128xf32, #tpu.memory_space<vmem>>, %arg7: memref<1x8x128xf32, #tpu.memory_space<vmem>>) attributes {dimension_semantics = [#tpu.dimension_semantics<parallel>], iteration_bounds = array<i64: 2>, scalar_prefetch = 0 : i64, scratch_operands = 0 : i64, tpu.core_type = #tpu.core_type<tc>, window_params = [{transform_indices = @transform_0, window_bounds = array<i64: 1, 4, 128>}, {pipeline_mode = #tpu.pipeline_mode<synchronous>, transform_indices = @transform_1, window_bounds = array<i64: 128, 128>}, {pipeline_mode = #tpu.pipeline_mode<synchronous>, transform_indices = @transform_2, window_bounds = array<i64: 128, 128>}, {pipeline_mode = #tpu.pipeline_mode<synchronous>, transform_indices = @transform_3, window_bounds = array<i64: 4, 8, 128>}, {pipeline_mode = #tpu.pipeline_mode<synchronous>, transform_indices = @transform_4, window_bounds = array<i64: 4, 8, 128>}, {pipeline_mode = #tpu.pipeline_mode<synchronous>, transform_indices = @transform_5, window_bounds = array<i64: 128, 128>}, {transform_indices = @transform_6, window_bounds = array<i64: 1, 8, 128>}]} {
    %c0 = arith.constant 0 : index
    %c0_0 = arith.constant 0 : index
    %c0_1 = arith.constant 0 : index
    %0 = vector.load %arg1[%c0, %c0_0, %c0_1] : memref<1x4x128xf32, #tpu.memory_space<vmem>>, vector<1x4x128xf32>
    %1 = vector.shape_cast %0 : vector<1x4x128xf32> to vector<4x128xf32>
    %c0_2 = arith.constant 0 : index
    %c0_3 = arith.constant 0 : index
    %2 = vector.load %arg2[%c0_2, %c0_3] : memref<128x128xf32, #tpu.memory_space<vmem>>, vector<128x128xf32>
    %cst = arith.constant dense<0.000000e+00> : vector<4x128xf32>
    %3 = tpu.matmul %1, %2, %cst {dimension_numbers = #tpu.dot_dimension_numbers<[1], [0], [0], [1], [0, 0, 1, 1], [], []>} : vector<4x128xf32>, vector<128x128xf32>, vector<4x128xf32> -> vector<4x128xf32>
    %c0_4 = arith.constant 0 : index
    %c0_5 = arith.constant 0 : index
    %4 = vector.load %arg3[%c0_4, %c0_5] : memref<128x128xf32, #tpu.memory_space<vmem>>, vector<128x128xf32>
    %cst_6 = arith.constant dense<0.000000e+00> : vector<4x128xf32>
    %5 = tpu.matmul %3, %4, %cst_6 {dimension_numbers = #tpu.dot_dimension_numbers<[1], [0], [0], [1], [0, 0, 1, 1], [], []>} : vector<4x128xf32>, vector<128x128xf32>, vector<4x128xf32> -> vector<4x128xf32>
    %6 = vector.shape_cast %3 : vector<4x128xf32> to vector<1x4x128xf32>
    %7 = vector.shape_cast %5 : vector<4x128xf32> to vector<1x4x128xf32>
    %cst_7 = arith.constant 0.000000e+00 : f32
    %8 = vector.broadcast %cst_7 : f32 to vector<1x8x128xf32>
    %9 = vector.extract_strided_slice %6 {offsets = [0, 0, 0], sizes = [1, 1, 128], strides = [1, 1, 1]} : vector<1x4x128xf32> to vector<1x1x128xf32>
    %c0_8 = arith.constant 0 : index
    %c0_9 = arith.constant 0 : index
    %c0_10 = arith.constant 0 : index
    %10 = vector.load %arg4[%c0_8, %c0_9, %c0_10] : memref<4x8x128xf32, #tpu.memory_space<vmem>>, vector<1x8x128xf32>
    %11 = vector.shape_cast %10 : vector<1x8x128xf32> to vector<8x128xf32>
    %12 = vector.shape_cast %11 : vector<8x128xf32> to vector<1x8x128xf32>
    %13 = vector.broadcast %9 : vector<1x1x128xf32> to vector<1x8x128xf32>
    %14 = arith.mulf %13, %12 : vector<1x8x128xf32>
    %15 = arith.addf %8, %14 : vector<1x8x128xf32>
    %16 = vector.extract_strided_slice %7 {offsets = [0, 0, 0], sizes = [1, 1, 128], strides = [1, 1, 1]} : vector<1x4x128xf32> to vector<1x1x128xf32>
    %c0_11 = arith.constant 0 : index
    %c0_12 = arith.constant 0 : index
    %c0_13 = arith.constant 0 : index
    %17 = vector.load %arg5[%c0_11, %c0_12, %c0_13] : memref<4x8x128xf32, #tpu.memory_space<vmem>>, vector<1x8x128xf32>
    %18 = vector.shape_cast %17 : vector<1x8x128xf32> to vector<8x128xf32>
    %19 = vector.shape_cast %18 : vector<8x128xf32> to vector<1x8x128xf32>
    %20 = vector.broadcast %16 : vector<1x1x128xf32> to vector<1x8x128xf32>
    %21 = arith.mulf %20, %19 : vector<1x8x128xf32>
    %22 = arith.addf %15, %21 : vector<1x8x128xf32>
    %23 = vector.extract_strided_slice %6 {offsets = [0, 1, 0], sizes = [1, 1, 128], strides = [1, 1, 1]} : vector<1x4x128xf32> to vector<1x1x128xf32>
    %c1 = arith.constant 1 : index
    %c0_14 = arith.constant 0 : index
    %c0_15 = arith.constant 0 : index
    %24 = vector.load %arg4[%c1, %c0_14, %c0_15] : memref<4x8x128xf32, #tpu.memory_space<vmem>>, vector<1x8x128xf32>
    %25 = vector.shape_cast %24 : vector<1x8x128xf32> to vector<8x128xf32>
    %26 = vector.shape_cast %25 : vector<8x128xf32> to vector<1x8x128xf32>
    %27 = vector.broadcast %23 : vector<1x1x128xf32> to vector<1x8x128xf32>
    %28 = arith.mulf %27, %26 : vector<1x8x128xf32>
    %29 = arith.addf %22, %28 : vector<1x8x128xf32>
    %30 = vector.extract_strided_slice %7 {offsets = [0, 1, 0], sizes = [1, 1, 128], strides = [1, 1, 1]} : vector<1x4x128xf32> to vector<1x1x128xf32>
    %c1_16 = arith.constant 1 : index
    %c0_17 = arith.constant 0 : index
    %c0_18 = arith.constant 0 : index
    %31 = vector.load %arg5[%c1_16, %c0_17, %c0_18] : memref<4x8x128xf32, #tpu.memory_space<vmem>>, vector<1x8x128xf32>
    %32 = vector.shape_cast %31 : vector<1x8x128xf32> to vector<8x128xf32>
    %33 = vector.shape_cast %32 : vector<8x128xf32> to vector<1x8x128xf32>
    %34 = vector.broadcast %30 : vector<1x1x128xf32> to vector<1x8x128xf32>
    %35 = arith.mulf %34, %33 : vector<1x8x128xf32>
    %36 = arith.addf %29, %35 : vector<1x8x128xf32>
    %37 = vector.extract_strided_slice %6 {offsets = [0, 2, 0], sizes = [1, 1, 128], strides = [1, 1, 1]} : vector<1x4x128xf32> to vector<1x1x128xf32>
    %c2 = arith.constant 2 : index
    %c0_19 = arith.constant 0 : index
    %c0_20 = arith.constant 0 : index
    %38 = vector.load %arg4[%c2, %c0_19, %c0_20] : memref<4x8x128xf32, #tpu.memory_space<vmem>>, vector<1x8x128xf32>
    %39 = vector.shape_cast %38 : vector<1x8x128xf32> to vector<8x128xf32>
    %40 = vector.shape_cast %39 : vector<8x128xf32> to vector<1x8x128xf32>
    %41 = vector.broadcast %37 : vector<1x1x128xf32> to vector<1x8x128xf32>
    %42 = arith.mulf %41, %40 : vector<1x8x128xf32>
    %43 = arith.addf %36, %42 : vector<1x8x128xf32>
    %44 = vector.extract_strided_slice %7 {offsets = [0, 2, 0], sizes = [1, 1, 128], strides = [1, 1, 1]} : vector<1x4x128xf32> to vector<1x1x128xf32>
    %c2_21 = arith.constant 2 : index
    %c0_22 = arith.constant 0 : index
    %c0_23 = arith.constant 0 : index
    %45 = vector.load %arg5[%c2_21, %c0_22, %c0_23] : memref<4x8x128xf32, #tpu.memory_space<vmem>>, vector<1x8x128xf32>
    %46 = vector.shape_cast %45 : vector<1x8x128xf32> to vector<8x128xf32>
    %47 = vector.shape_cast %46 : vector<8x128xf32> to vector<1x8x128xf32>
    %48 = vector.broadcast %44 : vector<1x1x128xf32> to vector<1x8x128xf32>
    %49 = arith.mulf %48, %47 : vector<1x8x128xf32>
    %50 = arith.addf %43, %49 : vector<1x8x128xf32>
    %51 = vector.extract_strided_slice %6 {offsets = [0, 3, 0], sizes = [1, 1, 128], strides = [1, 1, 1]} : vector<1x4x128xf32> to vector<1x1x128xf32>
    %c3 = arith.constant 3 : index
    %c0_24 = arith.constant 0 : index
    %c0_25 = arith.constant 0 : index
    %52 = vector.load %arg4[%c3, %c0_24, %c0_25] : memref<4x8x128xf32, #tpu.memory_space<vmem>>, vector<1x8x128xf32>
    %53 = vector.shape_cast %52 : vector<1x8x128xf32> to vector<8x128xf32>
    %54 = vector.shape_cast %53 : vector<8x128xf32> to vector<1x8x128xf32>
    %55 = vector.broadcast %51 : vector<1x1x128xf32> to vector<1x8x128xf32>
    %56 = arith.mulf %55, %54 : vector<1x8x128xf32>
    %57 = arith.addf %50, %56 : vector<1x8x128xf32>
    %58 = vector.extract_strided_slice %7 {offsets = [0, 3, 0], sizes = [1, 1, 128], strides = [1, 1, 1]} : vector<1x4x128xf32> to vector<1x1x128xf32>
    %c3_26 = arith.constant 3 : index
    %c0_27 = arith.constant 0 : index
    %c0_28 = arith.constant 0 : index
    %59 = vector.load %arg5[%c3_26, %c0_27, %c0_28] : memref<4x8x128xf32, #tpu.memory_space<vmem>>, vector<1x8x128xf32>
    %60 = vector.shape_cast %59 : vector<1x8x128xf32> to vector<8x128xf32>
    %61 = vector.shape_cast %60 : vector<8x128xf32> to vector<1x8x128xf32>
    %62 = vector.broadcast %58 : vector<1x1x128xf32> to vector<1x8x128xf32>
    %63 = arith.mulf %62, %61 : vector<1x8x128xf32>
    %64 = arith.addf %57, %63 : vector<1x8x128xf32>
    %65 = vector.shape_cast %64 : vector<1x8x128xf32> to vector<8x128xf32>
    %c0_29 = arith.constant 0 : index
    %c0_30 = arith.constant 0 : index
    %66 = vector.load %arg6[%c0_29, %c0_30] : memref<128x128xf32, #tpu.memory_space<vmem>>, vector<128x128xf32>
    %cst_31 = arith.constant dense<0.000000e+00> : vector<8x128xf32>
    %67 = tpu.matmul %65, %66, %cst_31 {dimension_numbers = #tpu.dot_dimension_numbers<[1], [0], [0], [1], [0, 0, 1, 1], [], []>} : vector<8x128xf32>, vector<128x128xf32>, vector<8x128xf32> -> vector<8x128xf32>
    %68 = vector.shape_cast %67 : vector<8x128xf32> to vector<1x8x128xf32>
    %c0_32 = arith.constant 0 : index
    %c0_33 = arith.constant 0 : index
    %c0_34 = arith.constant 0 : index
    %69 = vector.load %arg7[%c0_32, %c0_33, %c0_34] : memref<1x8x128xf32, #tpu.memory_space<vmem>>, vector<1x8x128xf32>
    tpu.vector_store %arg7[%c0_32, %c0_33, %c0_34], %68 {strides = array<i32>} : memref<1x8x128xf32, #tpu.memory_space<vmem>>, vector<1x8x128xf32>,
    return
  }
  func.func @transform_0(%arg0: i32) -> (i32, i32, i32) {
    %c0_i32 = arith.constant 0 : i32
    %c0_i32_0 = arith.constant 0 : i32
    %c0_i32_1 = arith.constant 0 : i32
    return %arg0, %c0_i32, %c0_i32_0 : i32, i32, i32
  }
  func.func @transform_1(%arg0: i32) -> (i32, i32) {
    %c0_i32 = arith.constant 0 : i32
    %c0_i32_0 = arith.constant 0 : i32
    %c0_i32_1 = arith.constant 0 : i32
    return %c0_i32, %c0_i32_0 : i32, i32
  }
  func.func @transform_2(%arg0: i32) -> (i32, i32) {
    %c0_i32 = arith.constant 0 : i32
    %c0_i32_0 = arith.constant 0 : i32
    %c0_i32_1 = arith.constant 0 : i32
    return %c0_i32, %c0_i32_0 : i32, i32
  }
  func.func @transform_3(%arg0: i32) -> (i32, i32, i32) {
    %c0_i32 = arith.constant 0 : i32
    %c0_i32_0 = arith.constant 0 : i32
    %c0_i32_1 = arith.constant 0 : i32
    %c0_i32_2 = arith.constant 0 : i32
    return %c0_i32, %c0_i32_0, %c0_i32_1 : i32, i32, i32
  }
  func.func @transform_4(%arg0: i32) -> (i32, i32, i32) {
    %c0_i32 = arith.constant 0 : i32
    %c0_i32_0 = arith.constant 0 : i32
    %c0_i32_1 = arith.constant 0 : i32
    %c0_i32_2 = arith.constant 0 : i32
    return %c0_i32, %c0_i32_0, %c0_i32_1 : i32, i32, i32
  }
  func.func @transform_5(%arg0: i32) -> (i32, i32) {
    %c0_i32 = arith.constant 0 : i32
    %c0_i32_0 = arith.constant 0 : i32
    %c0_i32_1 = arith.constant 0 : i32
    return %c0_i32, %c0_i32_0 : i32, i32
  }
  func.func @transform_6(%arg0: i32) -> (i32, i32, i32) {
    %c0_i32 = arith.constant 0 : i32
    %c0_i32_0 = arith.constant 0 : i32
    %c0_i32_1 = arith.constant 0 : i32
    return %arg0, %c0_i32, %c0_i32_0 : i32, i32, i32
  }
}

module attributes {stable_mosaic.version = 11 : i64} {
  func.func @_spectral_conv1d_kernel(%arg0: i32, %arg1: memref<1x4x128xf32, #tpu.memory_space<vmem>>, %arg2: memref<128x128xf32, #tpu.memory_space<vmem>>, %arg3: memref<128x128xf32, #tpu.memory_space<vmem>>, %arg4: memref<4x8x128xf32, #tpu.memory_space<vmem>>, %arg5: memref<4x8x128xf32, #tpu.memory_space<vmem>>, %arg6: memref<128x128xf32, #tpu.memory_space<vmem>>, %arg7: memref<1x8x128xf32, #tpu.memory_space<vmem>>) attributes {dimension_semantics = [#tpu.dimension_semantics<parallel>], iteration_bounds = array<i64: 2>, scalar_prefetch = 0 : i64, scratch_operands = 0 : i64, tpu.core_type = #tpu.core_type<tc>, window_params = [{transform_indices = @transform_0, window_bounds = array<i64: 1, 4, 128>}, {pipeline_mode = #tpu.pipeline_mode<synchronous>, transform_indices = @transform_1, window_bounds = array<i64: 128, 128>}, {pipeline_mode = #tpu.pipeline_mode<synchronous>, transform_indices = @transform_2, window_bounds = array<i64: 128, 128>}, {pipeline_mode = #tpu.pipeline_mode<synchronous>, transform_indices = @transform_3, window_bounds = array<i64: 4, 8, 128>}, {pipeline_mode = #tpu.pipeline_mode<synchronous>, transform_indices = @transform_4, window_bounds = array<i64: 4, 8, 128>}, {pipeline_mode = #tpu.pipeline_mode<synchronous>, transform_indices = @transform_5, window_bounds = array<i64: 128, 128>}, {transform_indices = @transform_6, window_bounds = array<i64: 1, 8, 128>}]} {
    %c0 = arith.constant 0 : index
    %c0_0 = arith.constant 0 : index
    %c0_1 = arith.constant 0 : index
    %0 = vector.load %arg1[%c0, %c0_0, %c0_1] : memref<1x4x128xf32, #tpu.memory_space<vmem>>, vector<1x4x128xf32>
    %1 = vector.shape_cast %0 : vector<1x4x128xf32> to vector<4x128xf32>
    %c0_2 = arith.constant 0 : index
    %c0_3 = arith.constant 0 : index
    %2 = vector.load %arg2[%c0_2, %c0_3] : memref<128x128xf32, #tpu.memory_space<vmem>>, vector<128x128xf32>
    %cst = arith.constant dense<0.000000e+00> : vector<4x128xf32>
    %3 = tpu.matmul %1, %2, %cst {dimension_numbers = #tpu.dot_dimension_numbers<[1], [0], [0], [1], [0, 0, 1, 1], [], []>} : vector<4x128xf32>, vector<128x128xf32>, vector<4x128xf32> -> vector<4x128xf32>
    %c0_4 = arith.constant 0 : index
    %c0_5 = arith.constant 0 : index
    %4 = vector.load %arg3[%c0_4, %c0_5] : memref<128x128xf32, #tpu.memory_space<vmem>>, vector<128x128xf32>
    %cst_6 = arith.constant dense<0.000000e+00> : vector<4x128xf32>
    %5 = tpu.matmul %3, %4, %cst_6 {dimension_numbers = #tpu.dot_dimension_numbers<[1], [0], [0], [1], [0, 0, 1, 1], [], []>} : vector<4x128xf32>, vector<128x128xf32>, vector<4x128xf32> -> vector<4x128xf32>
    %6 = vector.shape_cast %3 : vector<4x128xf32> to vector<1x4x128xf32>
    %7 = vector.shape_cast %5 : vector<4x128xf32> to vector<1x4x128xf32>
    %cst_7 = arith.constant 0.000000e+00 : f32
    %8 = vector.broadcast %cst_7 : f32 to vector<1x8x128xf32>
    %9 = vector.extract_strided_slice %6 {offsets = [0, 0, 0], sizes = [1, 1, 128], strides = [1, 1, 1]} : vector<1x4x128xf32> to vector<1x1x128xf32>
    %c0_8 = arith.constant 0 : index
    %c0_9 = arith.constant 0 : index
    %c0_10 = arith.constant 0 : index
    %10 = vector.load %arg4[%c0_8, %c0_9, %c0_10] : memref<4x8x128xf32, #tpu.memory_space<vmem>>, vector<1x8x128xf32>
    %11 = vector.shape_cast %10 : vector<1x8x128xf32> to vector<8x128xf32>
    %12 = vector.shape_cast %11 : vector<8x128xf32> to vector<1x8x128xf32>
    %13 = vector.broadcast %9 : vector<1x1x128xf32> to vector<1x8x128xf32>
    %14 = arith.mulf %13, %12 : vector<1x8x128xf32>
    %15 = arith.addf %8, %14 : vector<1x8x128xf32>
    %16 = vector.extract_strided_slice %7 {offsets = [0, 0, 0], sizes = [1, 1, 128], strides = [1, 1, 1]} : vector<1x4x128xf32> to vector<1x1x128xf32>
    %c0_11 = arith.constant 0 : index
    %c0_12 = arith.constant 0 : index
    %c0_13 = arith.constant 0 : index
    %17 = vector.load %arg5[%c0_11, %c0_12, %c0_13] : memref<4x8x128xf32, #tpu.memory_space<vmem>>, vector<1x8x128xf32>
    %18 = vector.shape_cast %17 : vector<1x8x128xf32> to vector<8x128xf32>
    %19 = vector.shape_cast %18 : vector<8x128xf32> to vector<1x8x128xf32>
    %20 = vector.broadcast %16 : vector<1x1x128xf32> to vector<1x8x128xf32>
    %21 = arith.mulf %20, %19 : vector<1x8x128xf32>
    %22 = arith.addf %15, %21 : vector<1x8x128xf32>
    %23 = vector.extract_strided_slice %6 {offsets = [0, 1, 0], sizes = [1, 1, 128], strides = [1, 1, 1]} : vector<1x4x128xf32> to vector<1x1x128xf32>
    %c1 = arith.constant 1 : index
    %c0_14 = arith.constant 0 : index
    %c0_15 = arith.constant 0 : index
    %24 = vector.load %arg4[%c1, %c0_14, %c0_15] : memref<4x8x128xf32, #tpu.memory_space<vmem>>, vector<1x8x128xf32>
    %25 = vector.shape_cast %24 : vector<1x8x128xf32> to vector<8x128xf32>
    %26 = vector.shape_cast %25 : vector<8x128xf32> to vector<1x8x128xf32>
    %27 = vector.broadcast %23 : vector<1x1x128xf32> to vector<1x8x128xf32>
    %28 = arith.mulf %27, %26 : vector<1x8x128xf32>
    %29 = arith.addf %22, %28 : vector<1x8x128xf32>
    %30 = vector.extract_strided_slice %7 {offsets = [0, 1, 0], sizes = [1, 1, 128], strides = [1, 1, 1]} : vector<1x4x128xf32> to vector<1x1x128xf32>
    %c1_16 = arith.constant 1 : index
    %c0_17 = arith.constant 0 : index
    %c0_18 = arith.constant 0 : index
    %31 = vector.load %arg5[%c1_16, %c0_17, %c0_18] : memref<4x8x128xf32, #tpu.memory_space<vmem>>, vector<1x8x128xf32>
    %32 = vector.shape_cast %31 : vector<1x8x128xf32> to vector<8x128xf32>
    %33 = vector.shape_cast %32 : vector<8x128xf32> to vector<1x8x128xf32>
    %34 = vector.broadcast %30 : vector<1x1x128xf32> to vector<1x8x128xf32>
    %35 = arith.mulf %34, %33 : vector<1x8x128xf32>
    %36 = arith.addf %29, %35 : vector<1x8x128xf32>
    %37 = vector.extract_strided_slice %6 {offsets = [0, 2, 0], sizes = [1, 1, 128], strides = [1, 1, 1]} : vector<1x4x128xf32> to vector<1x1x128xf32>
    %c2 = arith.constant 2 : index
    %c0_19 = arith.constant 0 : index
    %c0_20 = arith.constant 0 : index
    %38 = vector.load %arg4[%c2, %c0_19, %c0_20] : memref<4x8x128xf32, #tpu.memory_space<vmem>>, vector<1x8x128xf32>
    %39 = vector.shape_cast %38 : vector<1x8x128xf32> to vector<8x128xf32>
    %40 = vector.shape_cast %39 : vector<8x128xf32> to vector<1x8x128xf32>
    %41 = vector.broadcast %37 : vector<1x1x128xf32> to vector<1x8x128xf32>
    %42 = arith.mulf %41, %40 : vector<1x8x128xf32>
    %43 = arith.addf %36, %42 : vector<1x8x128xf32>
    %44 = vector.extract_strided_slice %7 {offsets = [0, 2, 0], sizes = [1, 1, 128], strides = [1, 1, 1]} : vector<1x4x128xf32> to vector<1x1x128xf32>
    %c2_21 = arith.constant 2 : index
    %c0_22 = arith.constant 0 : index
    %c0_23 = arith.constant 0 : index
    %45 = vector.load %arg5[%c2_21, %c0_22, %c0_23] : memref<4x8x128xf32, #tpu.memory_space<vmem>>, vector<1x8x128xf32>
    %46 = vector.shape_cast %45 : vector<1x8x128xf32> to vector<8x128xf32>
    %47 = vector.shape_cast %46 : vector<8x128xf32> to vector<1x8x128xf32>
    %48 = vector.broadcast %44 : vector<1x1x128xf32> to vector<1x8x128xf32>
    %49 = arith.mulf %48, %47 : vector<1x8x128xf32>
    %50 = arith.addf %43, %49 : vector<1x8x128xf32>
    %51 = vector.extract_strided_slice %6 {offsets = [0, 3, 0], sizes = [1, 1, 128], strides = [1, 1, 1]} : vector<1x4x128xf32> to vector<1x1x128xf32>
    %c3 = arith.constant 3 : index
    %c0_24 = arith.constant 0 : index
    %c0_25 = arith.constant 0 : index
    %52 = vector.load %arg4[%c3, %c0_24, %c0_25] : memref<4x8x128xf32, #tpu.memory_space<vmem>>, vector<1x8x128xf32>
    %53 = vector.shape_cast %52 : vector<1x8x128xf32> to vector<8x128xf32>
    %54 = vector.shape_cast %53 : vector<8x128xf32> to vector<1x8x128xf32>
    %55 = vector.broadcast %51 : vector<1x1x128xf32> to vector<1x8x128xf32>
    %56 = arith.mulf %55, %54 : vector<1x8x128xf32>
    %57 = arith.addf %50, %56 : vector<1x8x128xf32>
    %58 = vector.extract_strided_slice %7 {offsets = [0, 3, 0], sizes = [1, 1, 128], strides = [1, 1, 1]} : vector<1x4x128xf32> to vector<1x1x128xf32>
    %c3_26 = arith.constant 3 : index
    %c0_27 = arith.constant 0 : index
    %c0_28 = arith.constant 0 : index
    %59 = vector.load %arg5[%c3_26, %c0_27, %c0_28] : memref<4x8x128xf32, #tpu.memory_space<vmem>>, vector<1x8x128xf32>
    %60 = vector.shape_cast %59 : vector<1x8x128xf32> to vector<8x128xf32>
    %61 = vector.shape_cast %60 : vector<8x128xf32> to vector<1x8x128xf32>
    %62 = vector.broadcast %58 : vector<1x1x128xf32> to vector<1x8x128xf32>
    %63 = arith.mulf %62, %61 : vector<1x8x128xf32>
    %64 = arith.addf %57, %63 : vector<1x8x128xf32>
    %65 = vector.shape_cast %64 : vector<1x8x128xf32> to vector<8x128xf32>
    %c0_29 = arith.constant 0 : index
    %c0_30 = arith.constant 0 : index
    %66 = vector.load %arg6[%c0_29, %c0_30] : memref<128x128xf32, #tpu.memory_space<vmem>>, vector<128x128xf32>
    %cst_31 = arith.constant dense<0.000000e+00> : vector<8x128xf32>
    %67 = tpu.matmul %65, %66, %cst_31 {dimension_numbers = #tpu.dot_dimension_numbers<[1], [0], [0], [1], [0, 0, 1, 1], [], []>} : vector<8x128xf32>, vector<128x128xf32>, vector<8x128xf32> -> vector<8x128xf32>
    %68 = vector.shape_cast %67 : vector<8x128xf32> to vector<1x8x128xf32>
    %c0_32 = arith.constant 0 : index
    %c0_33 = arith.constant 0 : index
    %c0_34 = arith.constant 0 : index
    %69 = vector.load %arg7[%c0_32, %c0_33, %c0_34] : memref<1x8x128xf32, #tpu.memory_space<vmem>>, vector<1x8x128xf32>
    tpu.vector_store %arg7[%c0_32, %c0_33, %c0_34], %68 {strides = array<i32>} : memref<1x8x128xf32, #tpu.memory_space<vmem>>, vector<1x8x128xf32>,
    return
  }
  func.func @transform_0(%arg0: i32) -> (i32, i32, i32) {
    %c0_i32 = arith.constant 0 : i32
    %c0_i32_0 = arith.constant 0 : i32
    %c0_i32_1 = arith.constant 0 : i32
    return %arg0, %c0_i32, %c0_i32_0 : i32, i32, i32
  }
  func.func @transform_1(%arg0: i32) -> (i32, i32) {
    %c0_i32 = arith.constant 0 : i32
    %c0_i32_0 = arith.constant 0 : i32
    %c0_i32_1 = arith.constant 0 : i32
    return %c0_i32, %c0_i32_0 : i32, i32
  }
  func.func @transform_2(%arg0: i32) -> (i32, i32) {
    %c0_i32 = arith.constant 0 : i32
    %c0_i32_0 = arith.constant 0 : i32
    %c0_i32_1 = arith.constant 0 : i32
    return %c0_i32, %c0_i32_0 : i32, i32
  }
  func.func @transform_3(%arg0: i32) -> (i32, i32, i32) {
    %c0_i32 = arith.constant 0 : i32
    %c0_i32_0 = arith.constant 0 : i32
    %c0_i32_1 = arith.constant 0 : i32
    %c0_i32_2 = arith.constant 0 : i32
    return %c0_i32, %c0_i32_0, %c0_i32_1 : i32, i32, i32
  }
  func.func @transform_4(%arg0: i32) -> (i32, i32, i32) {
    %c0_i32 = arith.constant 0 : i32
    %c0_i32_0 = arith.constant 0 : i32
    %c0_i32_1 = arith.constant 0 : i32
    %c0_i32_2 = arith.constant 0 : i32
    return %c0_i32, %c0_i32_0, %c0_i32_1 : i32, i32, i32
  }
  func.func @transform_5(%arg0: i32) -> (i32, i32) {
    %c0_i32 = arith.constant 0 : i32
    %c0_i32_0 = arith.constant 0 : i32
    %c0_i32_1 = arith.constant 0 : i32
    return %c0_i32, %c0_i32_0 : i32, i32
  }
  func.func @transform_6(%arg0: i32) -> (i32, i32, i32) {
    %c0_i32 = arith.constant 0 : i32
    %c0_i32_0 = arith.constant 0 : i32
    %c0_i32_1 = arith.constant 0 : i32
    return %arg0, %c0_i32, %c0_i32_0 : i32, i32, i32
  }
}

</mosaic_0001>

<bundles_post_ra>
// kernel: tpu_custom_call.1
= control target key start
LH: loop header
LB: loop body
LE: loop exit
PB: predicated region body
PF: predicated region fallthrough
CT: control target
= control target key end

     0   :  { %11 = vsyncpa [#allocation3], 0  ;;  %s1231_s0 = inlined_call_operand.hbm [shape: f32[2,4,128], index: 0, kind: input, shape index: {}]   ;;  %s1232_s1 = inlined_call_operand.hbm [shape: f32[128,128], index: 1, kind: input, shape index: {}]   ;;  %s1233_s2 = inlined_call_operand.hbm [shape: f32[128,128], index: 2, kind: input, shape index: {}]   ;;  %s1234_s3 = inlined_call_operand.hbm [shape: f32[4,8,128], index: 3, kind: input, shape index: {}]   ;;  %s1235_s4 = inlined_call_operand.hbm [shape: f32[4,8,128], index: 4, kind: input, shape index: {}]   ;;  %s1236_s5 = inlined_call_operand.hbm [shape: f32[128,128], index: 5, kind: input, shape index: {}]   ;;  %s1237_s6 = inlined_call_operand.hbm [shape: f32[2,8,128], index: 6, kind: output, shape index: {}]  }
   0x1   :  { %13 = vsyncpa [#allocation3 + $0x1], 0 }
   0x2   :  { %14 = vsyncpa [#allocation6], 0 }
   0x3   :  { %15 = vsyncpa [#allocation9], 0 }
   0x4   :  { %16 = vsyncpa [#allocation12], 0 }
   0x5   :  { %17 = vsyncpa [#allocation4], 0 }
   0x6   :  { %19 = vsyncpa [#allocation4 + $0x1], 0  ;;  %s1057_s21 = smov 0   ;;  %s1059_s22 = smov 0  }
   0x7   :  { %s1061_s23 = smov 0   ;;  %s1063_s24 = smov 0  }
   0x8 LB: > { %s198_s27 = sshll.u32 %s1232_s1, 4  ;;  %s1081_s28 = sadd.s32 4294967295, %s1013_s24   ;;  %s1013_s24 = sphi %s1063_s24, %s1248_s24   ;;  %s1009_s23 = sphi %s1061_s23, %s1247_s23   ;;  %s1005_s22 = sphi %s1059_s22, %s1246_s22   ;;  %s1001_s21 = sphi %s1057_s21, %s1245_s21   ;;  %s199_s27 = int_to_ptr.hbm [resolvable:$true] %s198_s27 }
   0x9   : > { %p635_p0 = scmp.ge.s32.totalorder %s1013_s24, 1  ;;  %p46_p1 = scmp.eq.s32.totalorder %s1081_s28, 0 }
   0xa   : > { %p187_p2 = scmp.lt.s32.totalorder %s1013_s24, 3  ;;  %s1015_s30 = smov [#allocation5]  }
   0xb   : > { %s200_s7 = sshll.u32 %s1015_s30, 4  ;;  %s226_s10 = sshll.u32 %s1234_s3, 4  ;;  %s201_s7 = int_to_ptr.vmem [resolvable:$true] %s200_s7  ;;  %s227_s10 = int_to_ptr.hbm [resolvable:$true] %s226_s10 }
   0xc   : > { %p1086_p3 = pnand %p635_p0, %p187_p2  ;;  %s212_s14 = sshll.u32 %s1233_s2, 4  ;;  %s213_s14 = int_to_ptr.hbm [resolvable:$true] %s212_s14 }
   0xd   : > { %s1016_s15 = smov [#allocation8]   ;;  %s1017_s17 = smov 128  }
   0xe   : > { %p680_p4 = pneg %p1086_p3  ;;  %s228_s16 = sshll.u32 %s1016_s15, 4  ;;  %s229_s16 = int_to_ptr.vmem [resolvable:$true] %s228_s16 }
   0xf   : > { %s1018_s18 = smov 8   ;;  %s240_s25 = sshll.u32 %s1235_s4, 4  ;;  %s241_s25 = int_to_ptr.hbm [resolvable:$true] %s240_s25 }
  0x10   : > { %p1098_p6 = pnand %p680_p4, %p46_p1  ;;  %s1019_s26 = smov [#allocation7]  }
  0x11   : > { %s214_s30 = sshll.u32 %s1019_s26, 4  ;;  %s1021_s12 = smov [#allocation11]   ;;  %s215_s30 = int_to_ptr.vmem [resolvable:$true] %s214_s30 }
  0x12   : > { %683 = dma.hbm_to_vmem [thread:$0]  (!%p1098_p6), %s199_s27, 2048, %s201_s7, [#allocation6], %s1017_s17, %s1017_s17, %s1018_s18  }
  0x13   : > { %689 = dma.hbm_to_vmem [thread:$0]  (!%p1098_p6), %s227_s10, 512, %s229_s16, [#allocation9], %s1017_s17, %s1017_s17, %s1018_s18  }
  0x14   : > { %686 = dma.hbm_to_vmem [thread:$0]  (!%p1098_p6), %s213_s14, 2048, %s215_s30, [#allocation6], %s1017_s17, %s1017_s17, %s1018_s18  }
  0x15   : > { %s1020_s27 = smov [#allocation10]   ;;  %s254_s10 = sshll.u32 %s1236_s5, 4  ;;  %s255_s10 = int_to_ptr.hbm [resolvable:$true] %s254_s10 }
  0x16   : > { %s242_s7 = sshll.u32 %s1020_s27, 4  ;;  %s256_s13 = sshll.u32 %s1021_s12, 4  ;;  %s243_s7 = int_to_ptr.vmem [resolvable:$true] %s242_s7  ;;  %s257_s13 = int_to_ptr.vmem [resolvable:$true] %s256_s13 }
  0x17   : > { %692 = dma.hbm_to_vmem [thread:$0]  (!%p1098_p6), %s241_s25, 512, %s243_s7, [#allocation9], %s1017_s17, %s1017_s17, %s1018_s18  }
  0x18   : > { %695 = dma.hbm_to_vmem [thread:$0]  (!%p1098_p6), %s255_s10, 2048, %s257_s13, [#allocation12], %s1017_s17, %s1017_s17, %s1018_s18  }
  0x19   : > { %s634_s14 = sadd.s32 4294967294, %s1013_s24   ;;  %s1123_s15 = sadd.s32 1, %s1013_s24  }
  0x1a   : > { %s32_s16 = sadd.s32 1, %s1009_s23  ;;  %s29_s19 = ssub.s32 %s1013_s24, %s1123_s15 }
  0x1b   : > { %p39_p7 = scmp.ne.s32.totalorder %s1009_s23, %s1005_s22  ;;  %p30_p8 = scmp.eq.s32.totalorder %s29_s19, 0 }
  0x1c   : > { %p40_p9 = scmp.eq.s32.totalorder %s1013_s24, 0  ;;  %p45_p10 = scmp.ne.s32.totalorder %s1005_s22, %s1001_s21 }
  0x1d   : > { %p174_p11 = scmp.eq.s32.totalorder %s1081_s28, 1  ;;  %p180_p0 = scmp.eq.s32.totalorder %s634_s14, 1 }
  0x1e   : > { %s1135_s20 = scalar_select %p30_p8, %s1009_s23, %s32_s16  }
  0x1f   : > { %p1139_p12 = por %p46_p1, %p45_p10  ;;  %p1143_p13 = por %p174_p11, %p39_p7 }
  0x20   : > { %p41_p2 = por %p40_p9, %p39_p7  ;;  %s270_s18 = sand.u32 1, %s1009_s23  }
  0x21   : > { %p1148_p4 = por %p180_p0, %p45_p10  ;;  %p709_p6 = scmp.lt.s32.totalorder %s1013_s24, 2 }
  0x22   : > { %s642_s26 = sshll.u32 %s270_s18, 2  ;;  %s643_s30 = sshll.u32 %s1013_s24, 2 }
  0x23   : > { %s278_s8 = scalar_lea.hbm %s1231_s0, %s643_s30  ;;  %s274_s10 = scalar_lea.vmem [#allocation2], %s642_s26 }
  0x24   : > { %s280_s9 = sshll.u32 %s278_s8, 4  ;;  %s282_s12 = sshll.u32 %s274_s10, 4  ;;  %s281_s9 = int_to_ptr.hbm [resolvable:$true] %s280_s9  ;;  %s283_s12 = int_to_ptr.vmem [resolvable:$true] %s282_s12 }
  0x25   : > { %p1157_p8 = pnand %p709_p6, %p41_p2  ;;  %s271_s14 = scalar_lea.sflag [#allocation3], %s270_s18 }
  0x26   : > { %s905_s16 = sshra.s32 %s281_s9, 4  ;;  %s912_s26 = scalar_lea.hbm %s1231_s0, 8  ;;  %s906_s16 = int_to_ptr.hbm [resolvable:$true] %s905_s16 }
  0x27   : > { %s907_s19 = scalar_lea.hbm %s906_s16, 4  ;;  %p909_p9 = pneg %p1157_p8 }
  0x28   : > { %p908_p7 = scmp.ne.s32.totalorder %s906_s16, %s907_s19  ;;  %p913_p0 = scmp.lt.s32.totalorder %s906_s16, %s1231_s0 }
  0x29   : > { %p914_p2 = scmp.lt.s32.totalorder %s912_s26, %s907_s19 }
  0x2a   : > { %p910_p10 = pnand %p909_p9, %p908_p7 }
  0x2b   : > { %p915_p6 = por %p914_p2, %p913_p0 }
  0x2c   : > { %p911_p11 = pneg %p910_p10 }
  0x2e   : > { %p916_p5 = pnand %p915_p6, %p911_p11 }
  0x30   : > { %919 = shalt.err (!%p916_p5)
}
  0x31   : > { %699 = dma.hbm_to_vmem [thread:$0]  (!%p1157_p8), %s281_s9, 64, %s283_s12, %s271_s14  }
  0x32   : > { %291 = sbr.rel (%p1086_p3) target bundleno = 499 (0x1f3), region = 44  ;;  %s1174_s18 = sand.u32 (!%p1086_p3), 1, %s1005_s22  }
  0x33   : > { %s645_s10 = sshll.u32 (!%p1086_p3), %s1174_s18, 2  ;;  %s294_s30 = scalar_lea.sflag (!%p1086_p3), [#allocation3], %s1174_s18 }
  0x34   : > { %s1178_s27 = scalar_lea.vmem (!%p1086_p3), [#allocation2], %s645_s10 }
  0x37   : > { %980 = dma.done.wait (%p1139_p12), %s294_s30, 64  }
  0x38   : > { %982 = vsyncadd (%p1139_p12), %s294_s30, 4294967232 }
  0x39   : > { %984 = dma.done.wait (%p46_p1), [#allocation6], 4096  }
  0x3a   : > { %986 = vsyncadd (%p46_p1), [#allocation6], 4294963200 }
  0x3b   : > { %988 = dma.done.wait (%p46_p1), [#allocation9], 1024  }
  0x3c   : > { %990 = vsyncadd (%p46_p1), [#allocation9], 4294966272 }
  0x3d   : > { %992 = dma.done.wait (%p46_p1), [#allocation12], 2048  }
  0x3e   : > { %994 = vsyncadd (%p46_p1), [#allocation12], 4294965248  ;;  %v368_v0 = vld [vmem:[#allocation5 + $0x78] sm:$0xff]  ;;  %v367_v1 = vld [vmem:[#allocation5 + $0x70] sm:$0xff]  ;;  %s651_s29 = sshll.u32 %s1174_s18, 3  ;;  %s653_s11 = sshll.u32 %s1081_s28, 3 }
  0x3f   : > { %369 = vmatpush.msra.mxu0 %v368_v0  ;;  %v366_v2 = vld [vmem:[#allocation5 + $0x68] sm:$0xff]  ;;  %v365_v3 = vld [vmem:[#allocation5 + $0x60] sm:$0xff]  ;;  %v404_v4 = vld [vmem:[#allocation7 + $0x78] sm:$0xff]  ;;  %s511_s13 = scalar_lea.hbm %s1237_s6, %s653_s11  ;;  %s351_s14 = scalar_lea.vmem [#allocation13], %s651_s29 }
  0x40   : > { %v364_v5 = vld [vmem:[#allocation5 + $0x58] sm:$0xff]  ;;  %405 = vmatpush.msra.mxu1 %v404_v4  ;;  %v403_v6 = vld [vmem:[#allocation7 + $0x70] sm:$0xff]  ;;  %v402_v7 = vld [vmem:[#allocation7 + $0x68] sm:$0xff]  ;;  %s513_s16 = sshll.u32 %s351_s14, 4  ;;  %s515_s19 = sshll.u32 %s511_s13, 4  ;;  %s514_s16 = int_to_ptr.vmem [resolvable:$true] %s513_s16  ;;  %s516_s19 = int_to_ptr.hbm [resolvable:$true] %s515_s19 }
  0x41   : > { %370 = vmatpush.msra.mxu0 %v367_v1  ;;  %v363_v8 = vld [vmem:[#allocation5 + $0x50] sm:$0xff]  ;;  %v401_v9 = vld [vmem:[#allocation7 + $0x60] sm:$0xff]  ;;  %v362_v10 = vld [vmem:[#allocation5 + $0x48] sm:$0xff]  ;;  %s501_s26 = scalar_lea.sflag [#allocation4], %s1174_s18  ;;  %s949_s7 = sshra.s32 %s516_s19, 4  ;;  %s950_s7 = int_to_ptr.hbm [resolvable:$true] %s949_s7 }
  0x42   : > { %406 = vmatpush.msra.mxu1 %v403_v6  ;;  %v400_v11 = vld [vmem:[#allocation7 + $0x58] sm:$0xff]  ;;  %v361_v12 = vld [vmem:[#allocation5 + $0x40] sm:$0xff]  ;;  %v399_v13 = vld [vmem:[#allocation7 + $0x50] sm:$0xff]  ;;  %s951_s8 = scalar_lea.hbm %s950_s7, 8  ;;  %s955_s30 = scalar_lea.hbm %s1237_s6, 16 }
  0x43   : > { %371 = vmatpush.msra.mxu0 %v366_v2  ;;  %v360_v14 = vld [vmem:[#allocation5 + $0x38] sm:$0xff]  ;;  %v398_v15 = vld [vmem:[#allocation7 + $0x48] sm:$0xff]  ;;  %v359_v16 = vld [vmem:[#allocation5 + $0x30] sm:$0xff]  ;;  %p952_p1 = scmp.ne.s32.totalorder %s950_s7, %s951_s8  ;;  %p956_p12 = scmp.lt.s32.totalorder %s950_s7, %s1237_s6 }
  0x44   : > { %407 = vmatpush.msra.mxu1 %v402_v7  ;;  %v397_v17 = vld [vmem:[#allocation7 + $0x40] sm:$0xff]  ;;  %v358_v18 = vld [vmem:[#allocation5 + $0x28] sm:$0xff]  ;;  %v396_v19 = vld [vmem:[#allocation7 + $0x38] sm:$0xff]  ;;  %p957_p8 = scmp.lt.s32.totalorder %s955_s30, %s951_s8 }
  0x45   : > { %372 = vmatpush.msra.mxu0 %v365_v3  ;;  %v357_v20 = vld [vmem:[#allocation5 + $0x20] sm:$0xff]  ;;  %v395_v21 = vld [vmem:[#allocation7 + $0x30] sm:$0xff]  ;;  %v356_v22 = vld [vmem:[#allocation5 + $0x18] sm:$0xff]  ;;  %p953_p3 = pnand %p952_p1, %p1143_p13 }
  0x46   : > { %408 = vmatpush.msra.mxu1 %v401_v9  ;;  %v394_v23 = vld [vmem:[#allocation7 + $0x28] sm:$0xff]  ;;  %v355_v24 = vld [vmem:[#allocation5 + $0x10] sm:$0xff]  ;;  %v393_v25 = vld [vmem:[#allocation7 + $0x20] sm:$0xff]  ;;  %p958_p7 = por %p957_p8, %p956_p12 }
  0x47   : > { %373 = vmatpush.msra.mxu0 %v364_v5  ;;  %v354_v26 = vld [vmem:[#allocation5 + $0x8] sm:$0xff]  ;;  %v392_v27 = vld [vmem:[#allocation7 + $0x18] sm:$0xff]  ;;  %v353_v28 = vld [vmem:[#allocation5] sm:$0xff]  ;;  %p954_p5 = pneg %p953_p3 }
  0x48   : > { %409 = vmatpush.msra.mxu1 %v400_v11  ;;  %v352_v29 = vld [vmem:[%s1178_s27] sm:$0xf]  ;;  %v391_v30 = vld [vmem:[#allocation7 + $0x10] sm:$0xff]  ;;  %v390_v31 = vld [vmem:[#allocation7 + $0x8] sm:$0xff] }
  0x49   : > { %374 = vmatpush.msra.mxu0 %v363_v8  ;;  %v389_v32 = vld [vmem:[#allocation7] sm:$0xff]  ;;  %v478_v33 = vld [vmem:[#allocation11 + $0x78] sm:$0xff]  ;;  %v477_v34 = vld [vmem:[#allocation11 + $0x70] sm:$0xff]  ;;  %p959_p9 = pnand %p958_p7, %p954_p5 }
  0x4a   : > { %410 = vmatpush.msra.mxu1 %v399_v13  ;;  %479 = vmatpush.msra.mxu2 %v478_v33  ;;  %v476_v35 = vld [vmem:[#allocation11 + $0x68] sm:$0xff]  ;;  %v475_v36 = vld [vmem:[#allocation11 + $0x60] sm:$0xff]  ;;  %v474_v37 = vld [vmem:[#allocation11 + $0x58] sm:$0xff] }
  0x4b   : > { %375 = vmatpush.msra.mxu0 %v362_v10  ;;  %v473_v38 = vld [vmem:[#allocation11 + $0x50] sm:$0xff]  ;;  %v472_v40 = vld [vmem:[#allocation11 + $0x48] sm:$0xff]  ;;  %v471_v41 = vld [vmem:[#allocation11 + $0x40] sm:$0xff] }
  0x4c   : > { %411 = vmatpush.msra.mxu1 %v398_v15  ;;  %480 = vmatpush.msra.mxu2 %v477_v34  ;;  %v470_v42 = vld [vmem:[#allocation11 + $0x38] sm:$0xff]  ;;  %v469_v43 = vld [vmem:[#allocation11 + $0x30] sm:$0xff]  ;;  %v468_v44 = vld [vmem:[#allocation11 + $0x28] sm:$0xff] }
  0x4d   : > { %376 = vmatpush.msra.mxu0 %v361_v12  ;;  %v467_v45 = vld [vmem:[#allocation11 + $0x20] sm:$0xff]  ;;  %v466_v46 = vld [vmem:[#allocation11 + $0x18] sm:$0xff]  ;;  %v465_v47 = vld [vmem:[#allocation11 + $0x10] sm:$0xff] }
  0x4e   : > { %412 = vmatpush.msra.mxu1 %v397_v17  ;;  %481 = vmatpush.msra.mxu2 %v476_v35  ;;  %v464_v48 = vld [vmem:[#allocation11 + $0x8] sm:$0xff]  ;;  %v463_v49 = vld [vmem:[#allocation11] sm:$0xff]  ;;  %v444_v0 = vld [vmem:[#allocation8 + $0x10] sm:$0xff] }
  0x4f   : > { %377 = vmatpush.msra.mxu0 %v360_v14  ;;  %v425_v51 = vld [vmem:[#allocation8] sm:$0xff]  ;;  %v434_v56 = vld [vmem:[#allocation8 + $0x8] sm:$0xff]  ;;  %v449_v4 = vld [vmem:[#allocation10 + $0x10] sm:$0xff] }
  0x50   : > { %413 = vmatpush.msra.mxu1 %v396_v19  ;;  %482 = vmatpush.msra.mxu2 %v475_v36  ;;  %v429_v53 = vld [vmem:[#allocation10] sm:$0xff]  ;;  %v439_v60 = vld [vmem:[#allocation10 + $0x8] sm:$0xff]  ;;  %v454_v8 = vld [vmem:[#allocation8 + $0x18] sm:$0xff] }
  0x51   : > { %378 = vmatpush.msra.mxu0 %v359_v16  ;;  %v459_v12 = vld [vmem:[#allocation10 + $0x18] sm:$0xff] }
  0x52   : > { %414 = vmatpush.msra.mxu1 %v395_v21  ;;  %483 = vmatpush.msra.mxu2 %v474_v37 }
  0x53   : > { %379 = vmatpush.msra.mxu0 %v358_v18 }
  0x54   : > { %415 = vmatpush.msra.mxu1 %v394_v23  ;;  %484 = vmatpush.msra.mxu2 %v473_v38 }
  0x55   : > { %380 = vmatpush.msra.mxu0 %v357_v20 }
  0x56   : > { %416 = vmatpush.msra.mxu1 %v393_v25  ;;  %485 = vmatpush.msra.mxu2 %v472_v40 }
  0x57   : > { %381 = vmatpush.msra.mxu0 %v356_v22 }
  0x58   : > { %417 = vmatpush.msra.mxu1 %v392_v27  ;;  %486 = vmatpush.msra.mxu2 %v471_v41 }
  0x59   : > { %382 = vmatpush.msra.mxu0 %v355_v24 }
  0x5a   : > { %418 = vmatpush.msra.mxu1 %v391_v30  ;;  %487 = vmatpush.msra.mxu2 %v470_v42 }
  0x5b   : > { %383 = vmatpush.msra.mxu0 %v354_v26 }
  0x5c   : > { %419 = vmatpush.msra.mxu1 %v390_v31  ;;  %488 = vmatpush.msra.mxu2 %v469_v43 }
  0x5d   : > { %384 = vmatpush.msra.mxu0 %v353_v28 }
  0x5e   : > { %385 = vmatmul.f32.vlgmr.msra.gmra.mxu0 %v352_v29  ;;  %420 = vmatpush.msra.mxu1 %v389_v32 }
  0x5f   : > { %489 = vmatpush.msra.mxu2 %v468_v44 }
  0x61   : > { %490 = vmatpush.msra.mxu2 %v467_v45 }
  0x63   : > { %491 = vmatpush.msra.mxu2 %v466_v46 }
  0x65   : > { %492 = vmatpush.msra.mxu2 %v465_v47 }
  0x67   : > { %493 = vmatpush.msra.mxu2 %v464_v48 }
  0x69   : > { %494 = vmatpush.msra.mxu2 %v463_v49 }
  0xdb   : > { %v386_v39 = vpop.f32.mrf.mxu0 }
  0xdc   : > { %421 = vmatmul.f32.vlgmr.msra.gmra.mxu1 %v386_v39  ;;  %v426_v50 = vperm.slane %v386_v39, 0  ;;  %v435_v54 = vperm.slane %v386_v39, 1  ;;  %v445_v62 = vperm.slane %v386_v39, 2  ;;  %v455_v6 = vperm.slane %v386_v39, 3 }
  0xde   : > { %v427_v57 = vmul.f32 %v426_v50, %v425_v51  ;;  %v436_v61 = vmul.f32 %v435_v54, %v434_v56  ;;  %v446_v5 = vmul.f32 %v445_v62, %v444_v0  ;;  %v456_v14 = vmul.f32 %v455_v6, %v454_v8 }
 0x159   : > { %v422_v52 = vpop.f32.mrf.mxu1 }
 0x15a   : > { %v430_v55 = vperm.slane %v422_v52, 0  ;;  %v440_v59 = vperm.slane %v422_v52, 1  ;;  %v450_v3 = vperm.slane %v422_v52, 2  ;;  %v460_v10 = vperm.slane %v422_v52, 3 }
 0x15c   : > { %v431_v58 = vmul.f32 %v430_v55, %v429_v53  ;;  %v441_v2 = vmul.f32 %v440_v59, %v439_v60  ;;  %v451_v9 = vmul.f32 %v450_v3, %v449_v4  ;;  %v461_v16 = vmul.f32 %v460_v10, %v459_v12 }
 0x15e   : > { %v432_v63 = vadd.f32 %v431_v58, %v427_v57 }
 0x160   : > { %v437_v1 = vadd.f32 %v436_v61, %v432_v63 }
 0x162   : > { %v442_v7 = vadd.f32 %v441_v2, %v437_v1 }
 0x164   : > { %v447_v11 = vadd.f32 %v446_v5, %v442_v7 }
 0x166   : > { %v452_v13 = vadd.f32 %v451_v9, %v447_v11 }
 0x168   : > { %v457_v15 = vadd.f32 %v456_v14, %v452_v13 }
 0x16a   : > { %v462_v17 = vadd.f32 %v461_v16, %v457_v15 }
 0x16c   : > { %495 = vmatmul.f32.vlgmr.msra.gmra.mxu2 %v462_v17 }
 0x1ef   : > { %v496_v18 = vpop.f32.mrf.mxu2 }
 0x1f0   : > { %499 = vst [vmem:[%s351_s14] sm:$0xff] %v496_v18 }
 0x1f1   : > { %962 = shalt.err (!%p959_p9)
}
 0x1f2   : > { %678 = dma.vmem_to_hbm [thread:$0]  (%p1143_p13), %s514_s16, 128, %s516_s19, %s501_s26  }
 0x1f3 PF: > { %s527_s18 = sand.u32 1, %s1001_s21   ;;  %p1244_p10 = scmp.ge.s32.totalorder %s1013_s24, 2 }
 0x1f4   : > { %s528_s11 = scalar_lea.sflag [#allocation4], %s527_s18 }
 0x1f5   : > { %p701_p11 = pnand %p1244_p10, %p1148_p4 }
 0x1f7   : > { %p702_p0 = pneg %p701_p11 }
 0x1f9   : > { %996 = dma.done.wait (%p702_p0), %s528_s11, 128  }
 0x1fa   : > { %998 = vsyncadd (%p702_p0), %s528_s11, 4294967168  ;;  %p22_p2 = scmp.ge.s32.totalorder %s1123_s15, 4   ;;  %s1245_s21 = smov %s1005_s22 }
 0x1fb   : > { %s1246_s22 = smov %s1009_s23  ;;  %s1247_s23 = smov %s1135_s20 }
 0x1fc   : > { %s1248_s24 = smov %s1123_s15  ;;  %24 = sbr.rel (!%p22_p2) target bundleno = 8 (0x8), region = 115 }
 0x201   :  { %534 = vsyncpa [#allocation3], 1 }
 0x202   :  { %536 = vsyncpa [#allocation3 + $0x1], 1 }
 0x203   :  { %537 = vsyncpa [#allocation6], 1 }
 0x204   :  { %538 = vsyncpa [#allocation9], 1 }
 0x205   :  { %539 = vsyncpa [#allocation12], 1 }
 0x206   :  { %540 = vsyncpa [#allocation4], 1 }
 0x207   :  { %542 = vsyncpa [#allocation4 + $0x1], 1 }

// kernel: tpu_custom_call.1
= control target key start
LH: loop header
LB: loop body
LE: loop exit
PB: predicated region body
PF: predicated region fallthrough
CT: control target
= control target key end

     0   :  { %11 = vsyncpa [#allocation3], 0  ;;  %s1231_s0 = inlined_call_operand.hbm [shape: f32[2,4,128], index: 0, kind: input, shape index: {}]   ;;  %s1232_s1 = inlined_call_operand.hbm [shape: f32[128,128], index: 1, kind: input, shape index: {}]   ;;  %s1233_s2 = inlined_call_operand.hbm [shape: f32[128,128], index: 2, kind: input, shape index: {}]   ;;  %s1234_s3 = inlined_call_operand.hbm [shape: f32[4,8,128], index: 3, kind: input, shape index: {}]   ;;  %s1235_s4 = inlined_call_operand.hbm [shape: f32[4,8,128], index: 4, kind: input, shape index: {}]   ;;  %s1236_s5 = inlined_call_operand.hbm [shape: f32[128,128], index: 5, kind: input, shape index: {}]   ;;  %s1237_s6 = inlined_call_operand.hbm [shape: f32[2,8,128], index: 6, kind: output, shape index: {}]  }
   0x1   :  { %13 = vsyncpa [#allocation3 + $0x1], 0 }
   0x2   :  { %14 = vsyncpa [#allocation6], 0 }
   0x3   :  { %15 = vsyncpa [#allocation9], 0 }
   0x4   :  { %16 = vsyncpa [#allocation12], 0 }
   0x5   :  { %17 = vsyncpa [#allocation4], 0 }
   0x6   :  { %19 = vsyncpa [#allocation4 + $0x1], 0  ;;  %s1057_s21 = smov 0   ;;  %s1059_s22 = smov 0  }
   0x7   :  { %s1061_s23 = smov 0   ;;  %s1063_s24 = smov 0  }
   0x8 LB: > { %s198_s27 = sshll.u32 %s1232_s1, 4  ;;  %s1081_s28 = sadd.s32 4294967295, %s1013_s24   ;;  %s1013_s24 = sphi %s1063_s24, %s1248_s24   ;;  %s1009_s23 = sphi %s1061_s23, %s1247_s23   ;;  %s1005_s22 = sphi %s1059_s22, %s1246_s22   ;;  %s1001_s21 = sphi %s1057_s21, %s1245_s21   ;;  %s199_s27 = int_to_ptr.hbm [resolvable:$true] %s198_s27 }
   0x9   : > { %p635_p0 = scmp.ge.s32.totalorder %s1013_s24, 1  ;;  %p46_p1 = scmp.eq.s32.totalorder %s1081_s28, 0 }
   0xa   : > { %p187_p2 = scmp.lt.s32.totalorder %s1013_s24, 3  ;;  %s1015_s30 = smov [#allocation5]  }
   0xb   : > { %s200_s7 = sshll.u32 %s1015_s30, 4  ;;  %s226_s10 = sshll.u32 %s1234_s3, 4  ;;  %s201_s7 = int_to_ptr.vmem [resolvable:$true] %s200_s7  ;;  %s227_s10 = int_to_ptr.hbm [resolvable:$true] %s226_s10 }
   0xc   : > { %p1086_p3 = pnand %p635_p0, %p187_p2  ;;  %s212_s14 = sshll.u32 %s1233_s2, 4  ;;  %s213_s14 = int_to_ptr.hbm [resolvable:$true] %s212_s14 }
   0xd   : > { %s1016_s15 = smov [#allocation8]   ;;  %s1017_s17 = smov 128  }
   0xe   : > { %p680_p4 = pneg %p1086_p3  ;;  %s228_s16 = sshll.u32 %s1016_s15, 4  ;;  %s229_s16 = int_to_ptr.vmem [resolvable:$true] %s228_s16 }
   0xf   : > { %s1018_s18 = smov 8   ;;  %s240_s25 = sshll.u32 %s1235_s4, 4  ;;  %s241_s25 = int_to_ptr.hbm [resolvable:$true] %s240_s25 }
  0x10   : > { %p1098_p6 = pnand %p680_p4, %p46_p1  ;;  %s1019_s26 = smov [#allocation7]  }
  0x11   : > { %s214_s30 = sshll.u32 %s1019_s26, 4  ;;  %s1021_s12 = smov [#allocation11]   ;;  %s215_s30 = int_to_ptr.vmem [resolvable:$true] %s214_s30 }
  0x12   : > { %683 = dma.hbm_to_vmem [thread:$0]  (!%p1098_p6), %s199_s27, 2048, %s201_s7, [#allocation6], %s1017_s17, %s1017_s17, %s1018_s18  }
  0x13   : > { %689 = dma.hbm_to_vmem [thread:$0]  (!%p1098_p6), %s227_s10, 512, %s229_s16, [#allocation9], %s1017_s17, %s1017_s17, %s1018_s18  }
  0x14   : > { %686 = dma.hbm_to_vmem [thread:$0]  (!%p1098_p6), %s213_s14, 2048, %s215_s30, [#allocation6], %s1017_s17, %s1017_s17, %s1018_s18  }
  0x15   : > { %s1020_s27 = smov [#allocation10]   ;;  %s254_s10 = sshll.u32 %s1236_s5, 4  ;;  %s255_s10 = int_to_ptr.hbm [resolvable:$true] %s254_s10 }
  0x16   : > { %s242_s7 = sshll.u32 %s1020_s27, 4  ;;  %s256_s13 = sshll.u32 %s1021_s12, 4  ;;  %s243_s7 = int_to_ptr.vmem [resolvable:$true] %s242_s7  ;;  %s257_s13 = int_to_ptr.vmem [resolvable:$true] %s256_s13 }
  0x17   : > { %692 = dma.hbm_to_vmem [thread:$0]  (!%p1098_p6), %s241_s25, 512, %s243_s7, [#allocation9], %s1017_s17, %s1017_s17, %s1018_s18  }
  0x18   : > { %695 = dma.hbm_to_vmem [thread:$0]  (!%p1098_p6), %s255_s10, 2048, %s257_s13, [#allocation12], %s1017_s17, %s1017_s17, %s1018_s18  }
  0x19   : > { %s634_s14 = sadd.s32 4294967294, %s1013_s24   ;;  %s1123_s15 = sadd.s32 1, %s1013_s24  }
  0x1a   : > { %s32_s16 = sadd.s32 1, %s1009_s23  ;;  %s29_s19 = ssub.s32 %s1013_s24, %s1123_s15 }
  0x1b   : > { %p39_p7 = scmp.ne.s32.totalorder %s1009_s23, %s1005_s22  ;;  %p30_p8 = scmp.eq.s32.totalorder %s29_s19, 0 }
  0x1c   : > { %p40_p9 = scmp.eq.s32.totalorder %s1013_s24, 0  ;;  %p45_p10 = scmp.ne.s32.totalorder %s1005_s22, %s1001_s21 }
  0x1d   : > { %p174_p11 = scmp.eq.s32.totalorder %s1081_s28, 1  ;;  %p180_p0 = scmp.eq.s32.totalorder %s634_s14, 1 }
  0x1e   : > { %s1135_s20 = scalar_select %p30_p8, %s1009_s23, %s32_s16  }
  0x1f   : > { %p1139_p12 = por %p46_p1, %p45_p10  ;;  %p1143_p13 = por %p174_p11, %p39_p7 }
  0x20   : > { %p41_p2 = por %p40_p9, %p39_p7  ;;  %s270_s18 = sand.u32 1, %s1009_s23  }
  0x21   : > { %p1148_p4 = por %p180_p0, %p45_p10  ;;  %p709_p6 = scmp.lt.s32.totalorder %s1013_s24, 2 }
  0x22   : > { %s642_s26 = sshll.u32 %s270_s18, 2  ;;  %s643_s30 = sshll.u32 %s1013_s24, 2 }
  0x23   : > { %s278_s8 = scalar_lea.hbm %s1231_s0, %s643_s30  ;;  %s274_s10 = scalar_lea.vmem [#allocation2], %s642_s26 }
  0x24   : > { %s280_s9 = sshll.u32 %s278_s8, 4  ;;  %s282_s12 = sshll.u32 %s274_s10, 4  ;;  %s281_s9 = int_to_ptr.hbm [resolvable:$true] %s280_s9  ;;  %s283_s12 = int_to_ptr.vmem [resolvable:$true] %s282_s12 }
  0x25   : > { %p1157_p8 = pnand %p709_p6, %p41_p2  ;;  %s271_s14 = scalar_lea.sflag [#allocation3], %s270_s18 }
  0x26   : > { %s905_s16 = sshra.s32 %s281_s9, 4  ;;  %s912_s26 = scalar_lea.hbm %s1231_s0, 8  ;;  %s906_s16 = int_to_ptr.hbm [resolvable:$true] %s905_s16 }
  0x27   : > { %s907_s19 = scalar_lea.hbm %s906_s16, 4  ;;  %p909_p9 = pneg %p1157_p8 }
  0x28   : > { %p908_p7 = scmp.ne.s32.totalorder %s906_s16, %s907_s19  ;;  %p913_p0 = scmp.lt.s32.totalorder %s906_s16, %s1231_s0 }
  0x29   : > { %p914_p2 = scmp.lt.s32.totalorder %s912_s26, %s907_s19 }
  0x2a   : > { %p910_p10 = pnand %p909_p9, %p908_p7 }
  0x2b   : > { %p915_p6 = por %p914_p2, %p913_p0 }
  0x2c   : > { %p911_p11 = pneg %p910_p10 }
  0x2e   : > { %p916_p5 = pnand %p915_p6, %p911_p11 }
  0x30   : > { %919 = shalt.err (!%p916_p5)
}
  0x31   : > { %699 = dma.hbm_to_vmem [thread:$0]  (!%p1157_p8), %s281_s9, 64, %s283_s12, %s271_s14  }
  0x32   : > { %291 = sbr.rel (%p1086_p3) target bundleno = 499 (0x1f3), region = 44  ;;  %s1174_s18 = sand.u32 (!%p1086_p3), 1, %s1005_s22  }
  0x33   : > { %s645_s10 = sshll.u32 (!%p1086_p3), %s1174_s18, 2  ;;  %s294_s30 = scalar_lea.sflag (!%p1086_p3), [#allocation3], %s1174_s18 }
  0x34   : > { %s1178_s27 = scalar_lea.vmem (!%p1086_p3), [#allocation2], %s645_s10 }
  0x37   : > { %980 = dma.done.wait (%p1139_p12), %s294_s30, 64  }
  0x38   : > { %982 = vsyncadd (%p1139_p12), %s294_s30, 4294967232 }
  0x39   : > { %984 = dma.done.wait (%p46_p1), [#allocation6], 4096  }
  0x3a   : > { %986 = vsyncadd (%p46_p1), [#allocation6], 4294963200 }
  0x3b   : > { %988 = dma.done.wait (%p46_p1), [#allocation9], 1024  }
  0x3c   : > { %990 = vsyncadd (%p46_p1), [#allocation9], 4294966272 }
  0x3d   : > { %992 = dma.done.wait (%p46_p1), [#allocation12], 2048  }
  0x3e   : > { %994 = vsyncadd (%p46_p1), [#allocation12], 4294965248  ;;  %v368_v0 = vld [vmem:[#allocation5 + $0x78] sm:$0xff]  ;;  %v367_v1 = vld [vmem:[#allocation5 + $0x70] sm:$0xff]  ;;  %s651_s29 = sshll.u32 %s1174_s18, 3  ;;  %s653_s11 = sshll.u32 %s1081_s28, 3 }
  0x3f   : > { %369 = vmatpush.msra.mxu0 %v368_v0  ;;  %v366_v2 = vld [vmem:[#allocation5 + $0x68] sm:$0xff]  ;;  %v365_v3 = vld [vmem:[#allocation5 + $0x60] sm:$0xff]  ;;  %v404_v4 = vld [vmem:[#allocation7 + $0x78] sm:$0xff]  ;;  %s511_s13 = scalar_lea.hbm %s1237_s6, %s653_s11  ;;  %s351_s14 = scalar_lea.vmem [#allocation13], %s651_s29 }
  0x40   : > { %v364_v5 = vld [vmem:[#allocation5 + $0x58] sm:$0xff]  ;;  %405 = vmatpush.msra.mxu1 %v404_v4  ;;  %v403_v6 = vld [vmem:[#allocation7 + $0x70] sm:$0xff]  ;;  %v402_v7 = vld [vmem:[#allocation7 + $0x68] sm:$0xff]  ;;  %s513_s16 = sshll.u32 %s351_s14, 4  ;;  %s515_s19 = sshll.u32 %s511_s13, 4  ;;  %s514_s16 = int_to_ptr.vmem [resolvable:$true] %s513_s16  ;;  %s516_s19 = int_to_ptr.hbm [resolvable:$true] %s515_s19 }
  0x41   : > { %370 = vmatpush.msra.mxu0 %v367_v1  ;;  %v363_v8 = vld [vmem:[#allocation5 + $0x50] sm:$0xff]  ;;  %v401_v9 = vld [vmem:[#allocation7 + $0x60] sm:$0xff]  ;;  %v362_v10 = vld [vmem:[#allocation5 + $0x48] sm:$0xff]  ;;  %s501_s26 = scalar_lea.sflag [#allocation4], %s1174_s18  ;;  %s949_s7 = sshra.s32 %s516_s19, 4  ;;  %s950_s7 = int_to_ptr.hbm [resolvable:$true] %s949_s7 }
  0x42   : > { %406 = vmatpush.msra.mxu1 %v403_v6  ;;  %v400_v11 = vld [vmem:[#allocation7 + $0x58] sm:$0xff]  ;;  %v361_v12 = vld [vmem:[#allocation5 + $0x40] sm:$0xff]  ;;  %v399_v13 = vld [vmem:[#allocation7 + $0x50] sm:$0xff]  ;;  %s951_s8 = scalar_lea.hbm %s950_s7, 8  ;;  %s955_s30 = scalar_lea.hbm %s1237_s6, 16 }
  0x43   : > { %371 = vmatpush.msra.mxu0 %v366_v2  ;;  %v360_v14 = vld [vmem:[#allocation5 + $0x38] sm:$0xff]  ;;  %v398_v15 = vld [vmem:[#allocation7 + $0x48] sm:$0xff]  ;;  %v359_v16 = vld [vmem:[#allocation5 + $0x30] sm:$0xff]  ;;  %p952_p1 = scmp.ne.s32.totalorder %s950_s7, %s951_s8  ;;  %p956_p12 = scmp.lt.s32.totalorder %s950_s7, %s1237_s6 }
  0x44   : > { %407 = vmatpush.msra.mxu1 %v402_v7  ;;  %v397_v17 = vld [vmem:[#allocation7 + $0x40] sm:$0xff]  ;;  %v358_v18 = vld [vmem:[#allocation5 + $0x28] sm:$0xff]  ;;  %v396_v19 = vld [vmem:[#allocation7 + $0x38] sm:$0xff]  ;;  %p957_p8 = scmp.lt.s32.totalorder %s955_s30, %s951_s8 }
  0x45   : > { %372 = vmatpush.msra.mxu0 %v365_v3  ;;  %v357_v20 = vld [vmem:[#allocation5 + $0x20] sm:$0xff]  ;;  %v395_v21 = vld [vmem:[#allocation7 + $0x30] sm:$0xff]  ;;  %v356_v22 = vld [vmem:[#allocation5 + $0x18] sm:$0xff]  ;;  %p953_p3 = pnand %p952_p1, %p1143_p13 }
  0x46   : > { %408 = vmatpush.msra.mxu1 %v401_v9  ;;  %v394_v23 = vld [vmem:[#allocation7 + $0x28] sm:$0xff]  ;;  %v355_v24 = vld [vmem:[#allocation5 + $0x10] sm:$0xff]  ;;  %v393_v25 = vld [vmem:[#allocation7 + $0x20] sm:$0xff]  ;;  %p958_p7 = por %p957_p8, %p956_p12 }
  0x47   : > { %373 = vmatpush.msra.mxu0 %v364_v5  ;;  %v354_v26 = vld [vmem:[#allocation5 + $0x8] sm:$0xff]  ;;  %v392_v27 = vld [vmem:[#allocation7 + $0x18] sm:$0xff]  ;;  %v353_v28 = vld [vmem:[#allocation5] sm:$0xff]  ;;  %p954_p5 = pneg %p953_p3 }
  0x48   : > { %409 = vmatpush.msra.mxu1 %v400_v11  ;;  %v352_v29 = vld [vmem:[%s1178_s27] sm:$0xf]  ;;  %v391_v30 = vld [vmem:[#allocation7 + $0x10] sm:$0xff]  ;;  %v390_v31 = vld [vmem:[#allocation7 + $0x8] sm:$0xff] }
  0x49   : > { %374 = vmatpush.msra.mxu0 %v363_v8  ;;  %v389_v32 = vld [vmem:[#allocation7] sm:$0xff]  ;;  %v478_v33 = vld [vmem:[#allocation11 + $0x78] sm:$0xff]  ;;  %v477_v34 = vld [vmem:[#allocation11 + $0x70] sm:$0xff]  ;;  %p959_p9 = pnand %p958_p7, %p954_p5 }
  0x4a   : > { %410 = vmatpush.msra.mxu1 %v399_v13  ;;  %479 = vmatpush.msra.mxu2 %v478_v33  ;;  %v476_v35 = vld [vmem:[#allocation11 + $0x68] sm:$0xff]  ;;  %v475_v36 = vld [vmem:[#allocation11 + $0x60] sm:$0xff]  ;;  %v474_v37 = vld [vmem:[#allocation11 + $0x58] sm:$0xff] }
  0x4b   : > { %375 = vmatpush.msra.mxu0 %v362_v10  ;;  %v473_v38 = vld [vmem:[#allocation11 + $0x50] sm:$0xff]  ;;  %v472_v40 = vld [vmem:[#allocation11 + $0x48] sm:$0xff]  ;;  %v471_v41 = vld [vmem:[#allocation11 + $0x40] sm:$0xff] }
  0x4c   : > { %411 = vmatpush.msra.mxu1 %v398_v15  ;;  %480 = vmatpush.msra.mxu2 %v477_v34  ;;  %v470_v42 = vld [vmem:[#allocation11 + $0x38] sm:$0xff]  ;;  %v469_v43 = vld [vmem:[#allocation11 + $0x30] sm:$0xff]  ;;  %v468_v44 = vld [vmem:[#allocation11 + $0x28] sm:$0xff] }
  0x4d   : > { %376 = vmatpush.msra.mxu0 %v361_v12  ;;  %v467_v45 = vld [vmem:[#allocation11 + $0x20] sm:$0xff]  ;;  %v466_v46 = vld [vmem:[#allocation11 + $0x18] sm:$0xff]  ;;  %v465_v47 = vld [vmem:[#allocation11 + $0x10] sm:$0xff] }
  0x4e   : > { %412 = vmatpush.msra.mxu1 %v397_v17  ;;  %481 = vmatpush.msra.mxu2 %v476_v35  ;;  %v464_v48 = vld [vmem:[#allocation11 + $0x8] sm:$0xff]  ;;  %v463_v49 = vld [vmem:[#allocation11] sm:$0xff]  ;;  %v444_v0 = vld [vmem:[#allocation8 + $0x10] sm:$0xff] }
  0x4f   : > { %377 = vmatpush.msra.mxu0 %v360_v14  ;;  %v425_v51 = vld [vmem:[#allocation8] sm:$0xff]  ;;  %v434_v56 = vld [vmem:[#allocation8 + $0x8] sm:$0xff]  ;;  %v449_v4 = vld [vmem:[#allocation10 + $0x10] sm:$0xff] }
  0x50   : > { %413 = vmatpush.msra.mxu1 %v396_v19  ;;  %482 = vmatpush.msra.mxu2 %v475_v36  ;;  %v429_v53 = vld [vmem:[#allocation10] sm:$0xff]  ;;  %v439_v60 = vld [vmem:[#allocation10 + $0x8] sm:$0xff]  ;;  %v454_v8 = vld [vmem:[#allocation8 + $0x18] sm:$0xff] }
  0x51   : > { %378 = vmatpush.msra.mxu0 %v359_v16  ;;  %v459_v12 = vld [vmem:[#allocation10 + $0x18] sm:$0xff] }
  0x52   : > { %414 = vmatpush.msra.mxu1 %v395_v21  ;;  %483 = vmatpush.msra.mxu2 %v474_v37 }
  0x53   : > { %379 = vmatpush.msra.mxu0 %v358_v18 }
  0x54   : > { %415 = vmatpush.msra.mxu1 %v394_v23  ;;  %484 = vmatpush.msra.mxu2 %v473_v38 }
  0x55   : > { %380 = vmatpush.msra.mxu0 %v357_v20 }
  0x56   : > { %416 = vmatpush.msra.mxu1 %v393_v25  ;;  %485 = vmatpush.msra.mxu2 %v472_v40 }
  0x57   : > { %381 = vmatpush.msra.mxu0 %v356_v22 }
  0x58   : > { %417 = vmatpush.msra.mxu1 %v392_v27  ;;  %486 = vmatpush.msra.mxu2 %v471_v41 }
  0x59   : > { %382 = vmatpush.msra.mxu0 %v355_v24 }
  0x5a   : > { %418 = vmatpush.msra.mxu1 %v391_v30  ;;  %487 = vmatpush.msra.mxu2 %v470_v42 }
  0x5b   : > { %383 = vmatpush.msra.mxu0 %v354_v26 }
  0x5c   : > { %419 = vmatpush.msra.mxu1 %v390_v31  ;;  %488 = vmatpush.msra.mxu2 %v469_v43 }
  0x5d   : > { %384 = vmatpush.msra.mxu0 %v353_v28 }
  0x5e   : > { %385 = vmatmul.f32.vlgmr.msra.gmra.mxu0 %v352_v29  ;;  %420 = vmatpush.msra.mxu1 %v389_v32 }
  0x5f   : > { %489 = vmatpush.msra.mxu2 %v468_v44 }
  0x61   : > { %490 = vmatpush.msra.mxu2 %v467_v45 }
  0x63   : > { %491 = vmatpush.msra.mxu2 %v466_v46 }
  0x65   : > { %492 = vmatpush.msra.mxu2 %v465_v47 }
  0x67   : > { %493 = vmatpush.msra.mxu2 %v464_v48 }
  0x69   : > { %494 = vmatpush.msra.mxu2 %v463_v49 }
  0xdb   : > { %v386_v39 = vpop.f32.mrf.mxu0 }
  0xdc   : > { %421 = vmatmul.f32.vlgmr.msra.gmra.mxu1 %v386_v39  ;;  %v426_v50 = vperm.slane %v386_v39, 0  ;;  %v435_v54 = vperm.slane %v386_v39, 1  ;;  %v445_v62 = vperm.slane %v386_v39, 2  ;;  %v455_v6 = vperm.slane %v386_v39, 3 }
  0xde   : > { %v427_v57 = vmul.f32 %v426_v50, %v425_v51  ;;  %v436_v61 = vmul.f32 %v435_v54, %v434_v56  ;;  %v446_v5 = vmul.f32 %v445_v62, %v444_v0  ;;  %v456_v14 = vmul.f32 %v455_v6, %v454_v8 }
 0x159   : > { %v422_v52 = vpop.f32.mrf.mxu1 }
 0x15a   : > { %v430_v55 = vperm.slane %v422_v52, 0  ;;  %v440_v59 = vperm.slane %v422_v52, 1  ;;  %v450_v3 = vperm.slane %v422_v52, 2  ;;  %v460_v10 = vperm.slane %v422_v52, 3 }
 0x15c   : > { %v431_v58 = vmul.f32 %v430_v55, %v429_v53  ;;  %v441_v2 = vmul.f32 %v440_v59, %v439_v60  ;;  %v451_v9 = vmul.f32 %v450_v3, %v449_v4  ;;  %v461_v16 = vmul.f32 %v460_v10, %v459_v12 }
 0x15e   : > { %v432_v63 = vadd.f32 %v431_v58, %v427_v57 }
 0x160   : > { %v437_v1 = vadd.f32 %v436_v61, %v432_v63 }
 0x162   : > { %v442_v7 = vadd.f32 %v441_v2, %v437_v1 }
 0x164   : > { %v447_v11 = vadd.f32 %v446_v5, %v442_v7 }
 0x166   : > { %v452_v13 = vadd.f32 %v451_v9, %v447_v11 }
 0x168   : > { %v457_v15 = vadd.f32 %v456_v14, %v452_v13 }
 0x16a   : > { %v462_v17 = vadd.f32 %v461_v16, %v457_v15 }
 0x16c   : > { %495 = vmatmul.f32.vlgmr.msra.gmra.mxu2 %v462_v17 }
 0x1ef   : > { %v496_v18 = vpop.f32.mrf.mxu2 }
 0x1f0   : > { %499 = vst [vmem:[%s351_s14] sm:$0xff] %v496_v18 }
 0x1f1   : > { %962 = shalt.err (!%p959_p9)
}
 0x1f2   : > { %678 = dma.vmem_to_hbm [thread:$0]  (%p1143_p13), %s514_s16, 128, %s516_s19, %s501_s26  }
 0x1f3 PF: > { %s527_s18 = sand.u32 1, %s1001_s21   ;;  %p1244_p10 = scmp.ge.s32.totalorder %s1013_s24, 2 }
 0x1f4   : > { %s528_s11 = scalar_lea.sflag [#allocation4], %s527_s18 }
 0x1f5   : > { %p701_p11 = pnand %p1244_p10, %p1148_p4 }
 0x1f7   : > { %p702_p0 = pneg %p701_p11 }
 0x1f9   : > { %996 = dma.done.wait (%p702_p0), %s528_s11, 128  }
 0x1fa   : > { %998 = vsyncadd (%p702_p0), %s528_s11, 4294967168  ;;  %p22_p2 = scmp.ge.s32.totalorder %s1123_s15, 4   ;;  %s1245_s21 = smov %s1005_s22 }
 0x1fb   : > { %s1246_s22 = smov %s1009_s23  ;;  %s1247_s23 = smov %s1135_s20 }
 0x1fc   : > { %s1248_s24 = smov %s1123_s15  ;;  %24 = sbr.rel (!%p22_p2) target bundleno = 8 (0x8), region = 115 }
 0x201   :  { %534 = vsyncpa [#allocation3], 1 }
 0x202   :  { %536 = vsyncpa [#allocation3 + $0x1], 1 }
 0x203   :  { %537 = vsyncpa [#allocation6], 1 }
 0x204   :  { %538 = vsyncpa [#allocation9], 1 }
 0x205   :  { %539 = vsyncpa [#allocation12], 1 }
 0x206   :  { %540 = vsyncpa [#allocation4], 1 }
 0x207   :  { %542 = vsyncpa [#allocation4 + $0x1], 1 }

</bundles_post_ra>
